<compile_context>
chip_gen: v6e
topology: v6e:2x2x1
jax: 0.10.0
libtpu: 0.0.40
codegen_flags: <defaults>
</compile_context>

<pallas_src>
import math

import jax
import jax.numpy as jnp
from jax.experimental import pallas as pl
from jax.experimental.pallas import tpu as pltpu


# Tile budget expressed in *unfolded* rows of (512 + 256) f32 features:
#   2048 rows * 768 feats * 4 B * (in + out) ≈ 12 MiB per grid step,
#   ≈ 24 MiB live with double buffering -> fits the 32 MiB scoped limit we
#   request on every generation (v5e / v6e / v7x).
_MAX_TILE_ROWS = 2048


def _lane_fold(num_rows):
    """Fold factor for packing row pairs into the lane axis."""
    return 2 if (num_rows >= 2 and num_rows % 2 == 0) else 1


def _choose_row_tile(num_rows, fold):
    """Largest row tile (in folded rows): full extent if small, else a big
    multiple-of-8 tile; cdiv grid handles the padded boundary block."""
    cap = max(8, _MAX_TILE_ROWS // fold)
    if num_rows <= cap:
        return num_rows              # full-extent block (always legal)
    return cap                       # multiple of 8


def _compiler_params():
    return pltpu.CompilerParams(
        dimension_semantics=("parallel",),
        vmem_limit_bytes=32 * 1024 * 1024,
    )


# --------------------------------------------------------------------------
# Fused kernel: both modalities normalized in one grid pass over the rows.
# --------------------------------------------------------------------------
def _fused_scale_bias_kernel(xv_ref, xi_ref, sv_ref, bv_ref, si_ref, bi_ref,
                             ov_ref, oi_ref):
    # x refs: (tm, Df); scale/bias refs: (1, Df) resident across the grid.
    # Compute in f32, store in the input dtype (no write amplification).
    ov_ref[...] = (xv_ref[...].astype(jnp.float32) * sv_ref[...].astype(jnp.float32)
                   + bv_ref[...].astype(jnp.float32)).astype(ov_ref.dtype)
    oi_ref[...] = (xi_ref[...].astype(jnp.float32) * si_ref[...].astype(jnp.float32)
                   + bi_ref[...].astype(jnp.float32)).astype(oi_ref.dtype)


def _fused_input_normalization(visual, imu, params):
    lead = visual.shape[:-1]
    Dv = visual.shape[-1]
    Di = imu.shape[-1]
    R = int(math.prod(lead)) if lead else 1

    fold = _lane_fold(R)
    Rf = R // fold
    Dvf = Dv * fold
    Dif = Di * fold

    xv = visual.reshape(Rf, Dvf)
    xi = imu.reshape(Rf, Dif)

    # Tiling the (512,)/(256,) params on the host is free.
    sv = jnp.tile(params["visual_scale"].reshape(1, Dv), (1, fold))
    bv = jnp.tile(params["visual_bias"].reshape(1, Dv), (1, fold))
    si = jnp.tile(params["imu_scale"].reshape(1, Di), (1, fold))
    bi = jnp.tile(params["imu_bias"].reshape(1, Di), (1, fold))

    out_v_dtype = xv.dtype
    out_i_dtype = xi.dtype

    tm = _choose_row_tile(Rf, fold)
    grid = (pl.cdiv(Rf, tm),)

    bytes_accessed = (
        R * Dv * (xv.dtype.itemsize + jnp.dtype(out_v_dtype).itemsize)
        + R * Di * (xi.dtype.itemsize + jnp.dtype(out_i_dtype).itemsize)
        + Dvf * (sv.dtype.itemsize + bv.dtype.itemsize)
        + Dif * (si.dtype.itemsize + bi.dtype.itemsize)
    )
    cost = pl.CostEstimate(
        flops=2 * R * (Dv + Di),
        transcendentals=0,
        bytes_accessed=bytes_accessed,
    )

    ov, oi = pl.pallas_call(
        _fused_scale_bias_kernel,
        out_shape=(
            jax.ShapeDtypeStruct((Rf, Dvf), out_v_dtype),
            jax.ShapeDtypeStruct((Rf, Dif), out_i_dtype),
        ),
        grid_spec=pltpu.PrefetchScalarGridSpec(
            num_scalar_prefetch=0,
            grid=grid,
            in_specs=[
                pl.BlockSpec((tm, Dvf), lambda i: (i, 0)),   # visual rows
                pl.BlockSpec((tm, Dif), lambda i: (i, 0)),   # imu rows
                pl.BlockSpec((1, Dvf), lambda i: (0, 0)),    # visual scale (resident)
                pl.BlockSpec((1, Dvf), lambda i: (0, 0)),    # visual bias  (resident)
                pl.BlockSpec((1, Dif), lambda i: (0, 0)),    # imu scale    (resident)
                pl.BlockSpec((1, Dif), lambda i: (0, 0)),    # imu bias     (resident)
            ],
            out_specs=[
                pl.BlockSpec((tm, Dvf), lambda i: (i, 0)),
                pl.BlockSpec((tm, Dif), lambda i: (i, 0)),
            ],
        ),
        compiler_params=_compiler_params(),
        cost_estimate=cost,
    )(xv, xi, sv, bv, si, bi)

    return ov.reshape(visual.shape), oi.reshape(imu.shape)


# --------------------------------------------------------------------------
# Single-tensor fallback (used only if the two modalities disagree on their
# leading dims — PyTorch allows any broadcastable leading shape).
# --------------------------------------------------------------------------
def _scale_bias_kernel(x_ref, s_ref, b_ref, o_ref):
    o_ref[...] = (x_ref[...].astype(jnp.float32) * s_ref[...].astype(jnp.float32)
                  + b_ref[...].astype(jnp.float32)).astype(o_ref.dtype)


def scale_bias(x, scale, bias):
    """x: (..., D); scale/bias: (D,). Returns x * scale + bias (in x.dtype)."""
    orig_shape = x.shape
    D = orig_shape[-1]
    R = int(math.prod(orig_shape[:-1])) if orig_shape[:-1] else 1
    x2d = x.reshape(R, D)
    s2d = scale.reshape(1, D)
    b2d = bias.reshape(1, D)
    out_dtype = x2d.dtype

    tm = _choose_row_tile(R, 1)
    grid = (pl.cdiv(R, tm),)

    cost = pl.CostEstimate(
        flops=2 * R * D,
        transcendentals=0,
        bytes_accessed=R * D * (x2d.dtype.itemsize + jnp.dtype(out_dtype).itemsize)
        + D * (s2d.dtype.itemsize + b2d.dtype.itemsize),
    )

    out = pl.pallas_call(
        _scale_bias_kernel,
        out_shape=jax.ShapeDtypeStruct((R, D), out_dtype),
        grid_spec=pltpu.PrefetchScalarGridSpec(
            num_scalar_prefetch=0,
            grid=grid,
            in_specs=[
                pl.BlockSpec((tm, D), lambda i: (i, 0)),
                pl.BlockSpec((1, D), lambda i: (0, 0)),
                pl.BlockSpec((1, D), lambda i: (0, 0)),
            ],
            out_specs=pl.BlockSpec((tm, D), lambda i: (i, 0)),
        ),
        compiler_params=_compiler_params(),
        cost_estimate=cost,
    )(x2d, s2d, b2d)
    return out.reshape(orig_shape)


# --------------------------------------------------------------------------
# Public API: same semantics as InputNormalization.forward.
# --------------------------------------------------------------------------
def input_normalization(visual_features, imu_features, params):
    if (visual_features.ndim >= 1 and imu_features.ndim >= 1
            and visual_features.shape[:-1] == imu_features.shape[:-1]):
        return _fused_input_normalization(visual_features, imu_features, params)
    # Fallback: independent calls when leading dims differ.
    visual_norm = scale_bias(visual_features, params["visual_scale"],
                             params["visual_bias"])
    imu_norm = scale_bias(imu_features, params["imu_scale"], params["imu_bias"])
    return visual_norm, imu_norm


def init_params(visual_dim=512, imu_dim=256, dtype=jnp.float32):
    # Deterministic init exactly as in the PyTorch module __init__.
    return {
        "visual_scale": jnp.ones((visual_dim,), dtype),
        "visual_bias": jnp.zeros((visual_dim,), dtype),
        "imu_scale": jnp.ones((imu_dim,), dtype),
        "imu_bias": jnp.zeros((imu_dim,), dtype),
    }


if __name__ == "__main__":
    B, S = 2, 8
    visual_dim, imu_dim = 512, 256

    key = jax.random.PRNGKey(0)
    kv, ki = jax.random.split(key)
    visual = jax.random.normal(kv, (B, S, visual_dim), dtype=jnp.float32)
    imu = jax.random.normal(ki, (B, S, imu_dim), dtype=jnp.float32)

    params = init_params(visual_dim, imu_dim)

    v_out, i_out = input_normalization(visual, imu, params)
    jax.block_until_ready(v_out)
    jax.block_until_ready(i_out)

    # Reference check (pure JAX, same semantics as the torch module).
    v_ref = visual * params["visual_scale"] + params["visual_bias"]
    i_ref = imu * params["imu_scale"] + params["imu_bias"]
    assert v_out.shape == v_ref.shape and i_out.shape == i_ref.shape
    assert v_out.dtype == visual.dtype and i_out.dtype == imu.dtype
    assert jnp.allclose(v_out, v_ref, atol=1e-6)
    assert jnp.allclose(i_out, i_ref, atol=1e-6)

    print("KERNEL_OK")
</pallas_src>

<mosaic_0001>
module attributes {stable_mosaic.version = 11 : i64} {
  func.func @_fused_scale_bias_kernel(%arg0: i32, %arg1: memref<8x1024xf32, #tpu.memory_space<vmem>>, %arg2: memref<8x512xf32, #tpu.memory_space<vmem>>, %arg3: memref<1x1024xf32, #tpu.memory_space<vmem>>, %arg4: memref<1x1024xf32, #tpu.memory_space<vmem>>, %arg5: memref<1x512xf32, #tpu.memory_space<vmem>>, %arg6: memref<1x512xf32, #tpu.memory_space<vmem>>, %arg7: memref<8x1024xf32, #tpu.memory_space<vmem>>, %arg8: memref<8x512xf32, #tpu.memory_space<vmem>>) attributes {dimension_semantics = [#tpu.dimension_semantics<parallel>], iteration_bounds = array<i64: 1>, scalar_prefetch = 0 : i64, scratch_operands = 0 : i64, tpu.core_type = #tpu.core_type<tc>, window_params = [{transform_indices = @transform_0, window_bounds = array<i64: 8, 1024>}, {transform_indices = @transform_1, window_bounds = array<i64: 8, 512>}, {pipeline_mode = #tpu.pipeline_mode<synchronous>, transform_indices = @transform_2, window_bounds = array<i64: 1, 1024>}, {pipeline_mode = #tpu.pipeline_mode<synchronous>, transform_indices = @transform_3, window_bounds = array<i64: 1, 1024>}, {pipeline_mode = #tpu.pipeline_mode<synchronous>, transform_indices = @transform_4, window_bounds = array<i64: 1, 512>}, {pipeline_mode = #tpu.pipeline_mode<synchronous>, transform_indices = @transform_5, window_bounds = array<i64: 1, 512>}, {transform_indices = @transform_6, window_bounds = array<i64: 8, 1024>}, {transform_indices = @transform_7, window_bounds = array<i64: 8, 512>}]} {
    %c0 = arith.constant 0 : index
    %c0_0 = arith.constant 0 : index
    %0 = vector.load %arg1[%c0, %c0_0] : memref<8x1024xf32, #tpu.memory_space<vmem>>, vector<8x1024xf32>
    %c0_1 = arith.constant 0 : index
    %c0_2 = arith.constant 0 : index
    %1 = vector.load %arg3[%c0_1, %c0_2] : memref<1x1024xf32, #tpu.memory_space<vmem>>, vector<1x1024xf32>
    %2 = vector.broadcast %1 : vector<1x1024xf32> to vector<8x1024xf32>
    %3 = arith.mulf %0, %2 : vector<8x1024xf32>
    %c0_3 = arith.constant 0 : index
    %c0_4 = arith.constant 0 : index
    %4 = vector.load %arg4[%c0_3, %c0_4] : memref<1x1024xf32, #tpu.memory_space<vmem>>, vector<1x1024xf32>
    %5 = vector.broadcast %4 : vector<1x1024xf32> to vector<8x1024xf32>
    %6 = arith.addf %3, %5 : vector<8x1024xf32>
    %c0_5 = arith.constant 0 : index
    %c0_6 = arith.constant 0 : index
    %7 = vector.load %arg7[%c0_5, %c0_6] : memref<8x1024xf32, #tpu.memory_space<vmem>>, vector<8x1024xf32>
    tpu.vector_store %arg7[%c0_5, %c0_6], %6 {strides = array<i32>} : memref<8x1024xf32, #tpu.memory_space<vmem>>, vector<8x1024xf32>,
    %c0_7 = arith.constant 0 : index
    %c0_8 = arith.constant 0 : index
    %8 = vector.load %arg2[%c0_7, %c0_8] : memref<8x512xf32, #tpu.memory_space<vmem>>, vector<8x512xf32>
    %c0_9 = arith.constant 0 : index
    %c0_10 = arith.constant 0 : index
    %9 = vector.load %arg5[%c0_9, %c0_10] : memref<1x512xf32, #tpu.memory_space<vmem>>, vector<1x512xf32>
    %10 = vector.broadcast %9 : vector<1x512xf32> to vector<8x512xf32>
    %11 = arith.mulf %8, %10 : vector<8x512xf32>
    %c0_11 = arith.constant 0 : index
    %c0_12 = arith.constant 0 : index
    %12 = vector.load %arg6[%c0_11, %c0_12] : memref<1x512xf32, #tpu.memory_space<vmem>>, vector<1x512xf32>
    %13 = vector.broadcast %12 : vector<1x512xf32> to vector<8x512xf32>
    %14 = arith.addf %11, %13 : vector<8x512xf32>
    %c0_13 = arith.constant 0 : index
    %c0_14 = arith.constant 0 : index
    %15 = vector.load %arg8[%c0_13, %c0_14] : memref<8x512xf32, #tpu.memory_space<vmem>>, vector<8x512xf32>
    tpu.vector_store %arg8[%c0_13, %c0_14], %14 {strides = array<i32>} : memref<8x512xf32, #tpu.memory_space<vmem>>, vector<8x512xf32>,
    return
  }
  func.func @transform_0(%arg0: i32) -> (i32, i32) {
    %c0_i32 = arith.constant 0 : i32
    %c0_i32_0 = arith.constant 0 : i32
    return %arg0, %c0_i32 : i32, i32
  }
  func.func @transform_1(%arg0: i32) -> (i32, i32) {
    %c0_i32 = arith.constant 0 : i32
    %c0_i32_0 = arith.constant 0 : i32
    return %arg0, %c0_i32 : i32, i32
  }
  func.func @transform_2(%arg0: i32) -> (i32, i32) {
    %c0_i32 = arith.constant 0 : i32
    %c0_i32_0 = arith.constant 0 : i32
    %c0_i32_1 = arith.constant 0 : i32
    return %c0_i32, %c0_i32_0 : i32, i32
  }
  func.func @transform_3(%arg0: i32) -> (i32, i32) {
    %c0_i32 = arith.constant 0 : i32
    %c0_i32_0 = arith.constant 0 : i32
    %c0_i32_1 = arith.constant 0 : i32
    return %c0_i32, %c0_i32_0 : i32, i32
  }
  func.func @transform_4(%arg0: i32) -> (i32, i32) {
    %c0_i32 = arith.constant 0 : i32
    %c0_i32_0 = arith.constant 0 : i32
    %c0_i32_1 = arith.constant 0 : i32
    return %c0_i32, %c0_i32_0 : i32, i32
  }
  func.func @transform_5(%arg0: i32) -> (i32, i32) {
    %c0_i32 = arith.constant 0 : i32
    %c0_i32_0 = arith.constant 0 : i32
    %c0_i32_1 = arith.constant 0 : i32
    return %c0_i32, %c0_i32_0 : i32, i32
  }
  func.func @transform_6(%arg0: i32) -> (i32, i32) {
    %c0_i32 = arith.constant 0 : i32
    %c0_i32_0 = arith.constant 0 : i32
    return %arg0, %c0_i32 : i32, i32
  }
  func.func @transform_7(%arg0: i32) -> (i32, i32) {
    %c0_i32 = arith.constant 0 : i32
    %c0_i32_0 = arith.constant 0 : i32
    return %arg0, %c0_i32 : i32, i32
  }
}

</mosaic_0001>

<bundles_post_ra>
// kernel: tpu_custom_call.1
= control target key start
LH: loop header
LB: loop body
LE: loop exit
PB: predicated region body
PF: predicated region fallthrough
CT: control target
= control target key end

     0   :  { %13 = vsyncpa [#allocation3], 0  ;;  %s511_s0 = inlined_call_operand.hbm [shape: f32[8,1024], index: 0, kind: input, shape index: {}]   ;;  %s512_s1 = inlined_call_operand.hbm [shape: f32[8,512], index: 1, kind: input, shape index: {}]   ;;  %s513_s2 = inlined_call_operand.hbm [shape: f32[1,1024], index: 2, kind: input, shape index: {}]   ;;  %s514_s3 = inlined_call_operand.hbm [shape: f32[1,1024], index: 3, kind: input, shape index: {}]   ;;  %s515_s4 = inlined_call_operand.vmem [shape: f32[1,512], index: 4, kind: input, shape index: {}]   ;;  %s516_s5 = inlined_call_operand.vmem [shape: f32[1,512], index: 5, kind: input, shape index: {}]   ;;  %s517_s6 = inlined_call_operand.hbm [shape: f32[8,1024], index: 6, kind: output, shape index: {0}]   ;;  %s518_s7 = inlined_call_operand.hbm [shape: f32[8,512], index: 7, kind: output, shape index: {1}]  }
   0x1   :  { %14 = vsyncpa [#allocation6], 0 }
   0x2   :  { %15 = vsyncpa [#allocation9], 0 }
   0x3   :  { %16 = vsyncpa [#allocation4], 0 }
   0x4   :  { %17 = vsyncpa [#allocation12], 0  ;;  %s417_s24 = smov [#allocation5]   ;;  %s418_s26 = smov [#allocation2]  }
   0x5   :  { %s34_s25 = sshll.u32 %s417_s24, 4  ;;  %s24_s27 = sshll.u32 %s418_s26, 4  ;;  %s35_s25 = int_to_ptr.vmem [resolvable:$true] %s34_s25  ;;  %s25_s27 = int_to_ptr.vmem [resolvable:$true] %s24_s27 }
   0x6   :  { %s295_s28 = scalar_lea.vmem %s35_s25, 512  ;;  %p300_p1 = scmp.lt.s32.totalorder %s35_s25, %s35_s25 }
   0x7   :  { %p296_p0 = scmp.ne.s32.totalorder %s35_s25, %s295_s28  ;;  %p301_p2 = scmp.lt.s32.totalorder %s295_s28, %s295_s28 }
   0x9   :  { %p302_p3 = por %p301_p2, %p300_p1 }
   0xb   :  { %p303_p4 = pnand %p302_p3, %p296_p0 }
   0xd   :  { %306 = shalt.err (!%p303_p4)
}
   0xe   :  { %37 = dma.hbm_to_vmem [thread:$0]  %s512_s1, 512, %s35_s25, [#allocation6]  }
   0xf   :  { %s315_s8 = scalar_lea.vmem %s25_s27, 1024  ;;  %p320_p6 = scmp.lt.s32.totalorder %s25_s27, %s25_s27 }
  0x10   :  { %p316_p5 = scmp.ne.s32.totalorder %s25_s27, %s315_s8  ;;  %p321_p7 = scmp.lt.s32.totalorder %s315_s8, %s315_s8 }
  0x12   :  { %p322_p8 = por %p321_p7, %p320_p6 }
  0x14   :  { %p323_p9 = pnand %p322_p8, %p316_p5 }
  0x16   :  { %326 = shalt.err (!%p323_p9)
}
  0x17   :  { %27 = dma.hbm_to_vmem [thread:$0]  %s511_s0, 1024, %s25_s27, [#allocation3]  }
  0x18   :  { %s419_s11 = smov [#allocation7]   ;;  %s420_s13 = smov [#allocation8]  }
  0x19   :  { %s44_s12 = sshll.u32 %s419_s11, 4  ;;  %s54_s14 = sshll.u32 %s420_s13, 4  ;;  %s45_s12 = int_to_ptr.vmem [resolvable:$true] %s44_s12  ;;  %s55_s14 = int_to_ptr.vmem [resolvable:$true] %s54_s14 }
  0x1a   :  { %s335_s15 = scalar_lea.vmem %s45_s12, 128  ;;  %p340_p11 = scmp.lt.s32.totalorder %s45_s12, %s45_s12 }
  0x1b   :  { %p336_p10 = scmp.ne.s32.totalorder %s45_s12, %s335_s15  ;;  %p341_p12 = scmp.lt.s32.totalorder %s335_s15, %s335_s15 }
  0x1d   :  { %p342_p13 = por %p341_p12, %p340_p11 }
  0x1f   :  { %p343_p0 = pnand %p342_p13, %p336_p10 }
  0x21   :  { %346 = shalt.err (!%p343_p0)
}
  0x22   :  { %47 = dma.hbm_to_vmem [thread:$0]  %s513_s2, 128, %s45_s12, [#allocation6]  }
  0x23   :  { %s355_s17 = scalar_lea.vmem %s55_s14, 128  ;;  %p360_p2 = scmp.lt.s32.totalorder %s55_s14, %s55_s14 }
  0x24   :  { %p356_p1 = scmp.ne.s32.totalorder %s55_s14, %s355_s17  ;;  %p361_p3 = scmp.lt.s32.totalorder %s355_s17, %s355_s17 }
  0x26   :  { %p362_p4 = por %p361_p3, %p360_p2 }
  0x28   :  { %p363_p5 = pnand %p362_p4, %p356_p1 }
  0x2a   :  { %366 = shalt.err (!%p363_p5)
}
  0x2b   :  { %57 = dma.hbm_to_vmem [thread:$0]  %s514_s3, 128, %s55_s14, [#allocation9]  }
  0x2c   :  { %407 = dma.done.wait [#allocation3], 1024  }
  0x2d   :  { %408 = vsyncadd [#allocation3], 4294966272 }
  0x2e   :  { %409 = dma.done.wait [#allocation6], 640  }
  0x2f   :  { %410 = vsyncadd [#allocation6], 4294966656 }
  0x30   :  { %411 = dma.done.wait [#allocation9], 128  }
  0x31   :  { %412 = vsyncadd [#allocation9], 4294967168  ;;  %v84_v0 = vlaneseq  ;;  %v74_v7 = vld [vmem:[#allocation2] sm:$0xff]  ;;  %v132_v9 = vld [vmem:[#allocation8] sm:$0xff]  ;;  %s422_s21 = smov [#allocation11]  }
  0x32   :  { %v82_v8 = vld [vmem:[#allocation7] sm:$0xff]  ;;  %v75_v15 = vld [vmem:[#allocation2 + $0x8] sm:$0xff]  ;;  %v76_v18 = vld [vmem:[#allocation2 + $0x10] sm:$0xff]  ;;  %s266_s22 = sshll.u32 %s422_s21, 4  ;;  %s267_s22 = int_to_ptr.vmem [resolvable:$true] %s266_s22 }
  0x33   :  { %v85_v1 = vshrl.u32 %v84_v0, 7  ;;  %v77_v19 = vld [vmem:[#allocation2 + $0x18] sm:$0xff]  ;;  %v78_v24 = vld [vmem:[#allocation2 + $0x20] sm:$0xff]  ;;  %v79_v29 = vld [vmem:[#allocation2 + $0x28] sm:$0xff] }
  0x34   :  { %v80_v34 = vld [vmem:[#allocation2 + $0x30] sm:$0xff]  ;;  %v194_v39 = vld [vmem:[%s515_s4] sm:$0xf]  ;;  %v81_v45 = vld [vmem:[#allocation2 + $0x38] sm:$0xff]  ;;  %s421_s4 = smov [#allocation10]  }
  0x35   :  { %v475_v2 = vsub.s32 0, %v85_v1  ;;  %v477_v3 = vsub.s32 1, %v85_v1  ;;  %v479_v4 = vsub.s32 2, %v85_v1  ;;  %v481_v5 = vsub.s32 3, %v85_v1  ;;  %v220_v40 = vld [vmem:[%s516_s5] sm:$0xf] }
  0x36   :  { %v102_v6 = vsub.s32 4, %v85_v1  ;;  %v106_v10 = vsub.s32 5, %v85_v1  ;;  %v110_v11 = vsub.s32 6, %v85_v1  ;;  %v114_v12 = vsub.s32 7, %v85_v1  ;;  %v190_v50 = vld [vmem:[#allocation5] sm:$0xff]  ;;  %v191_v51 = vld [vmem:[#allocation5 + $0x8] sm:$0xff] }
  0x37   :  { %v87_v13 = vrot.slane %v82_v8, %v475_v2  ;;  %v137_v14 = vrot.slane %v132_v9, %v475_v2  ;;  %v91_v16 = vrot.slane %v82_v8, %v477_v3  ;;  %v141_v17 = vrot.slane %v132_v9, %v477_v3  ;;  %v192_v56 = vld [vmem:[#allocation5 + $0x10] sm:$0xff]  ;;  %s256_s5 = sshll.u32 %s421_s4, 4  ;;  %v193_v61 = vld [vmem:[#allocation5 + $0x18] sm:$0xff]  ;;  %s257_s5 = int_to_ptr.vmem [resolvable:$true] %s256_s5 }
  0x38   :  { %v95_v20 = vrot.slane %v82_v8, %v479_v4  ;;  %v145_v21 = vrot.slane %v132_v9, %v479_v4  ;;  %v99_v22 = vrot.slane %v82_v8, %v481_v5  ;;  %v149_v23 = vrot.slane %v132_v9, %v481_v5  ;;  %s367_s23 = scalar_lea.vmem %s257_s5, 1024  ;;  %p372_p7 = scmp.lt.s32.totalorder %s257_s5, %s257_s5 }
  0x39   :  { %v124_v25 = vmul.f32 %v87_v13, %v74_v7  ;;  %v125_v26 = vmul.f32 %v91_v16, %v75_v15  ;;  %v103_v27 = vrot.slane %v82_v8, %v102_v6  ;;  %v153_v28 = vrot.slane %v132_v9, %v102_v6  ;;  %p368_p6 = scmp.ne.s32.totalorder %s257_s5, %s367_s23  ;;  %p373_p8 = scmp.lt.s32.totalorder %s367_s23, %s367_s23 }
  0x3a   :  { %v126_v30 = vmul.f32 %v95_v20, %v76_v18  ;;  %v127_v31 = vmul.f32 %v99_v22, %v77_v19  ;;  %v107_v32 = vrot.slane %v82_v8, %v106_v10  ;;  %v157_v33 = vrot.slane %v132_v9, %v106_v10 }
  0x3b   :  { %v174_v35 = vadd.f32 %v137_v14, %v124_v25  ;;  %v175_v36 = vadd.f32 %v141_v17, %v125_v26  ;;  %v128_v37 = vmul.f32 %v103_v27, %v78_v24  ;;  %v111_v38 = vrot.slane %v82_v8, %v110_v11  ;;  %p374_p9 = por %p373_p8, %p372_p7 }
  0x3c   :  { %v176_v41 = vadd.f32 %v145_v21, %v126_v30  ;;  %v177_v42 = vadd.f32 %v149_v23, %v127_v31  ;;  %v129_v43 = vmul.f32 %v107_v32, %v79_v29  ;;  %v161_v44 = vrot.slane %v132_v9, %v110_v11 }
  0x3d   :  { %182 = vst [vmem:[#allocation10] sm:$0xff] %v174_v35  ;;  %183 = vst [vmem:[#allocation10 + $0x8] sm:$0xff] %v175_v36  ;;  %v178_v46 = vadd.f32 %v153_v28, %v128_v37  ;;  %v130_v47 = vmul.f32 %v111_v38, %v80_v34  ;;  %v115_v48 = vrot.slane %v82_v8, %v114_v12  ;;  %p375_p10 = pnand %p374_p9, %p368_p6 }
  0x3e   :  { %v165_v49 = vrot.slane %v132_v9, %v114_v12  ;;  %184 = vst [vmem:[#allocation10 + $0x10] sm:$0xff] %v176_v41  ;;  %185 = vst [vmem:[#allocation10 + $0x18] sm:$0xff] %v177_v42  ;;  %v179_v52 = vadd.f32 %v157_v33, %v129_v43  ;;  %v199_v53 = vrot.slane %v194_v39, %v475_v2 }
  0x3f   :  { %v225_v54 = vrot.slane %v220_v40, %v475_v2  ;;  %v203_v55 = vrot.slane %v194_v39, %v477_v3  ;;  %186 = vst [vmem:[#allocation10 + $0x20] sm:$0xff] %v178_v46  ;;  %v180_v57 = vadd.f32 %v161_v44, %v130_v47  ;;  %v131_v58 = vmul.f32 %v115_v48, %v81_v45 }
  0x40   :  { %v229_v59 = vrot.slane %v220_v40, %v477_v3  ;;  %v207_v60 = vrot.slane %v194_v39, %v479_v4  ;;  %187 = vst [vmem:[#allocation10 + $0x28] sm:$0xff] %v179_v52  ;;  %v216_v62 = vmul.f32 %v199_v53, %v190_v50  ;;  %v233_v0 = vrot.slane %v220_v40, %v479_v4 }
  0x41   :  { %v217_v63 = vmul.f32 %v203_v55, %v191_v51  ;;  %v211_v1 = vrot.slane %v194_v39, %v481_v5  ;;  %188 = vst [vmem:[#allocation10 + $0x30] sm:$0xff] %v180_v57  ;;  %v181_v2 = vadd.f32 %v165_v49, %v131_v58  ;;  %v237_v7 = vrot.slane %v220_v40, %v481_v5 }
  0x42   :  { %v218_v6 = vmul.f32 %v207_v60, %v192_v56  ;;  %v242_v8 = vadd.f32 %v225_v54, %v216_v62 }
  0x43   :  { %v243_v3 = vadd.f32 %v229_v59, %v217_v63  ;;  %v219_v9 = vmul.f32 %v211_v1, %v193_v61  ;;  %189 = vst [vmem:[#allocation10 + $0x38] sm:$0xff] %v181_v2 }
  0x44   :  { %v244_v10 = vadd.f32 %v233_v0, %v218_v6  ;;  %246 = vst [vmem:[#allocation11] sm:$0xff] %v242_v8 }
  0x45   :  { %247 = vst [vmem:[#allocation11 + $0x8] sm:$0xff] %v243_v3  ;;  %v245_v11 = vadd.f32 %v237_v7, %v219_v9 }
  0x46   :  { %378 = shalt.err (!%p375_p10)
}
  0x47   :  { %259 = dma.vmem_to_hbm [thread:$0]  %s257_s5, 1024, %s517_s6, [#allocation4]   ;;  %248 = vst [vmem:[#allocation11 + $0x10] sm:$0xff] %v244_v10  ;;  %249 = vst [vmem:[#allocation11 + $0x18] sm:$0xff] %v245_v11 }
  0x48   :  { %s387_s26 = scalar_lea.vmem %s267_s22, 512  ;;  %p392_p12 = scmp.lt.s32.totalorder %s267_s22, %s267_s22 }
  0x49   :  { %p388_p11 = scmp.ne.s32.totalorder %s267_s22, %s387_s26  ;;  %p393_p13 = scmp.lt.s32.totalorder %s387_s26, %s387_s26 }
  0x4b   :  { %p394_p0 = por %p393_p13, %p392_p12 }
  0x4d   :  { %p395_p1 = pnand %p394_p0, %p388_p11 }
  0x4f   :  { %398 = shalt.err (!%p395_p1)
}
  0x50   :  { %269 = dma.vmem_to_hbm [thread:$0]  %s267_s22, 512, %s518_s7, [#allocation12]  }
  0x51   :  { %413 = dma.done.wait [#allocation4], 1024  }
  0x52   :  { %414 = vsyncadd [#allocation4], 4294966272 }
  0x53   :  { %415 = dma.done.wait [#allocation12], 512  }
  0x54   :  { %416 = vsyncadd [#allocation12], 4294966784 }
  0x55   :  { %276 = vsyncpa [#allocation3], 1 }
  0x56   :  { %277 = vsyncpa [#allocation6], 1 }
  0x57   :  { %278 = vsyncpa [#allocation9], 1 }
  0x58   :  { %279 = vsyncpa [#allocation4], 1 }
  0x59   :  { %280 = vsyncpa [#allocation12], 1 }

</bundles_post_ra>
